<compile_context>
chip_gen: v6e
topology: v6e:2x2x1
jax: 0.10.0
libtpu: 0.0.40
codegen_flags: <defaults>
</compile_context>

<pallas_src>
import functools

import jax
import jax.numpy as jnp
from jax.experimental import pallas as pl
from jax.experimental.pallas import tpu as pltpu


def _rmsnorm_kernel(x_ref, w_ref, o_ref, *, eps):
    # x_ref: (tile_rows, d_model), w_ref: (1, d_model), o_ref: (tile_rows, d_model)
    x = x_ref[...].astype(jnp.float32)
    w = w_ref[...].astype(jnp.float32)
    # Mean-of-squares in f32; rsqrt goes to the EUP (separate bundle slot).
    inv = jax.lax.rsqrt(jnp.mean(x * x, axis=-1, keepdims=True) + eps)
    o_ref[...] = ((x * inv) * w).astype(o_ref.dtype)


def _choose_tile_rows(rows, d_model, itemsize,
                      buffer_budget_bytes=24 * 1024 * 1024):
    """Largest row tile whose double-buffered in+out blocks fit the budget.

    Pallas double-buffers the input and output blocks, so each resident row
    costs ~4 * d_model * itemsize bytes of VMEM.  A 24 MiB buffer budget
    (with headroom in vmem_limit_bytes for f32 temporaries) is safe on
    v5e/v6e (128 MiB physical VMEM) and on v7x (64 MiB per TC).
    """
    bytes_per_row = 4 * d_model * itemsize
    max_rows = max(8, buffer_budget_bytes // max(bytes_per_row, 1))
    tile = min(1024, max_rows)
    # Never allocate more rows than the (8-rounded) problem actually has.
    tile = min(tile, ((rows + 7) // 8) * 8)
    # Keep the sublane dim a multiple of 8.
    tile = max(8, (tile // 8) * 8)
    return int(tile)


def rmsnorm(x, weight, eps=1e-5, *, tile_rows=None):
    """RMSNorm over the last axis of x, scaled by weight (shape [d_model])."""
    orig_shape = x.shape
    d_model = orig_shape[-1]
    rows = 1
    for s in orig_shape[:-1]:
        rows *= s
    x2 = x.reshape(rows, d_model)
    w2 = weight.reshape(1, d_model)

    if tile_rows is None:
        tile_rows = _choose_tile_rows(rows, d_model, jnp.dtype(x.dtype).itemsize)

    # No jnp.pad / slice round-trip: cdiv grid + Pallas partial-block masking
    # avoids an extra full HBM pass over x and out.
    grid = (pl.cdiv(rows, tile_rows),)

    kernel = functools.partial(_rmsnorm_kernel, eps=eps)

    # TODO(synk): if production d_model is not a multiple of 128, pad the
    # feature dim at the model level to keep output stores lane-dense.
    out = pl.pallas_call(
        kernel,
        out_shape=jax.ShapeDtypeStruct((rows, d_model), x.dtype),
        grid_spec=pltpu.PrefetchScalarGridSpec(
            num_scalar_prefetch=0,
            grid=grid,
            in_specs=[
                pl.BlockSpec((tile_rows, d_model), lambda i: (i, 0)),
                pl.BlockSpec((1, d_model), lambda i: (0, 0)),
            ],
            out_specs=pl.BlockSpec((tile_rows, d_model), lambda i: (i, 0)),
        ),
        compiler_params=pltpu.CompilerParams(
            # Row grid shards across v7x's two TensorCores; no-op on v5e/v6e.
            dimension_semantics=("parallel",),
            # Raise the scoped VMEM limit so the large row tiles are accepted
            # on all generations (default scoped limit is 16-32 MiB).
            vmem_limit_bytes=48 * 1024 * 1024,
        ),
    )(x2, w2)

    return out.reshape(orig_shape)


if __name__ == "__main__":
    key = jax.random.PRNGKey(0)
    batch, seq, d_model = 2, 8, 32
    x = jax.random.normal(key, (batch, seq, d_model), dtype=jnp.float32)
    # Deterministic parameter init: the module's __init__ uses ones(d_model).
    weight = jnp.ones((d_model,), dtype=jnp.float32)

    y = rmsnorm(x, weight, eps=1e-5)
    jax.block_until_ready(y)

    # Reference check in plain JAX (matches the PyTorch forward).
    mean = jnp.sqrt(jnp.mean(x ** 2, axis=-1, keepdims=True) + 1e-5)
    y_ref = (x / mean) * weight
    assert y.shape == x.shape and y.dtype == x.dtype
    assert jnp.allclose(y, y_ref, atol=1e-5, rtol=1e-5)

    print("KERNEL_OK")
</pallas_src>

<mosaic_0001>
module attributes {stable_mosaic.version = 11 : i64} {
  func.func @_rmsnorm_kernel(%arg0: i32, %arg1: memref<16x32xf32, #tpu.memory_space<vmem>>, %arg2: memref<1x32xf32, #tpu.memory_space<vmem>>, %arg3: memref<16x32xf32, #tpu.memory_space<vmem>>) attributes {dimension_semantics = [#tpu.dimension_semantics<parallel>], iteration_bounds = array<i64: 1>, scalar_prefetch = 0 : i64, scratch_operands = 0 : i64, tpu.core_type = #tpu.core_type<tc>, window_params = [{transform_indices = @transform_0, window_bounds = array<i64: 16, 32>}, {pipeline_mode = #tpu.pipeline_mode<synchronous>, transform_indices = @transform_1, window_bounds = array<i64: 1, 32>}, {transform_indices = @transform_2, window_bounds = array<i64: 16, 32>}]} {
    %c0 = arith.constant 0 : index
    %c0_0 = arith.constant 0 : index
    %0 = vector.load %arg1[%c0, %c0_0] : memref<16x32xf32, #tpu.memory_space<vmem>>, vector<16x32xf32>
    %c0_1 = arith.constant 0 : index
    %c0_2 = arith.constant 0 : index
    %1 = vector.load %arg2[%c0_1, %c0_2] : memref<1x32xf32, #tpu.memory_space<vmem>>, vector<1x32xf32>
    %2 = arith.mulf %0, %0 : vector<16x32xf32>
    %cst = arith.constant dense<0.000000e+00> : vector<16xf32>
    %3 = vector.multi_reduction <add>, %2, %cst [1] : vector<16x32xf32> to vector<16xf32>
    %4 = vector.shape_cast %3 : vector<16xf32> to vector<16x1xf32>
    %cst_3 = arith.constant 3.200000e+01 : f32
    %5 = vector.broadcast %cst_3 : f32 to vector<16x1xf32>
    %6 = arith.divf %4, %5 : vector<16x1xf32>
    %cst_4 = arith.constant 9.99999974E-6 : f32
    %7 = vector.broadcast %cst_4 : f32 to vector<16x1xf32>
    %8 = arith.addf %6, %7 : vector<16x1xf32>
    %9 = math.rsqrt %8 : vector<16x1xf32>
    %10 = vector.broadcast %9 : vector<16x1xf32> to vector<16x32xf32>
    %11 = arith.mulf %0, %10 : vector<16x32xf32>
    %12 = vector.broadcast %1 : vector<1x32xf32> to vector<16x32xf32>
    %13 = arith.mulf %11, %12 : vector<16x32xf32>
    %c0_5 = arith.constant 0 : index
    %c0_6 = arith.constant 0 : index
    %14 = vector.load %arg3[%c0_5, %c0_6] : memref<16x32xf32, #tpu.memory_space<vmem>>, vector<16x32xf32>
    tpu.vector_store %arg3[%c0_5, %c0_6], %13 {strides = array<i32>} : memref<16x32xf32, #tpu.memory_space<vmem>>, vector<16x32xf32>,
    return
  }
  func.func @transform_0(%arg0: i32) -> (i32, i32) {
    %c0_i32 = arith.constant 0 : i32
    %c0_i32_0 = arith.constant 0 : i32
    return %arg0, %c0_i32 : i32, i32
  }
  func.func @transform_1(%arg0: i32) -> (i32, i32) {
    %c0_i32 = arith.constant 0 : i32
    %c0_i32_0 = arith.constant 0 : i32
    %c0_i32_1 = arith.constant 0 : i32
    return %c0_i32, %c0_i32_0 : i32, i32
  }
  func.func @transform_2(%arg0: i32) -> (i32, i32) {
    %c0_i32 = arith.constant 0 : i32
    %c0_i32_0 = arith.constant 0 : i32
    return %arg0, %c0_i32 : i32, i32
  }
}

</mosaic_0001>

<bundles_post_ra>
// kernel: tpu_custom_call.1
= control target key start
LH: loop header
LB: loop body
LE: loop exit
PB: predicated region body
PF: predicated region fallthrough
CT: control target
= control target key end

     0   :  { %7 = vsyncpa [#allocation3], 0  ;;  %s165_s0 = inlined_call_operand.hbm [shape: f32[16,32], index: 0, kind: input, shape index: {}]   ;;  %s166_s1 = inlined_call_operand.vmem [shape: f32[1,32], index: 1, kind: input, shape index: {}]   ;;  %s167_s2 = inlined_call_operand.hbm [shape: f32[16,32], index: 2, kind: output, shape index: {}]  }
   0x1   :  { %8 = vsyncpa [#allocation4], 0  ;;  %s127_s9 = smov [#allocation2]  }
   0x2   :  { %s14_s10 = sshll.u32 %s127_s9, 4  ;;  %s15_s10 = int_to_ptr.vmem [resolvable:$true] %s14_s10 }
   0x3   :  { %s91_s11 = scalar_lea.vmem %s15_s10, 256  ;;  %p96_p1 = scmp.lt.s32.totalorder %s15_s10, %s15_s10 }
   0x4   :  { %p92_p0 = scmp.ne.s32.totalorder %s15_s10, %s91_s11  ;;  %p97_p2 = scmp.lt.s32.totalorder %s91_s11, %s91_s11 }
   0x6   :  { %p98_p3 = por %p97_p2, %p96_p1 }
   0x8   :  { %p99_p4 = pnand %p98_p3, %p92_p0 }
   0xa   :  { %102 = shalt.err (!%p99_p4)
}
   0xb   :  { %s128_s12 = smov 128   ;;  %s129_s13 = smov 8  }
   0xc   :  { %20 = dma.hbm_to_vmem [thread:$0]  %s165_s0, 256, %s15_s10, [#allocation3], %s128_s12, %s128_s12, %s129_s13  }
   0xd   :  { %123 = dma.done.wait [#allocation3], 256  }
   0xe   :  { %124 = vsyncadd [#allocation3], 4294967040  ;;  %v26_v0 = vld [vmem:[#allocation2] sm:$0xff]  ;;  %vm31_vm0 = vcmask 261120   ;;  %v27_v1 = vld [vmem:[#allocation2 + $0x8] sm:$0xff]  ;;  %s130_s17 = smov [#allocation5]  }
   0xf   :  { %v29_v2 = vmul.f32 %v26_v0, %v26_v0  ;;  %v30_v3 = vmul.f32 %v27_v1, %v27_v1  ;;  %v74_v13 = vld [vmem:[%s166_s1] ss:$0 sm:$0xff]  ;;  %s62_s18 = sshll.u32 %s130_s17, 4  ;;  %s63_s18 = int_to_ptr.vmem [resolvable:$true] %s62_s18 }
  0x10   :  { %s103_s19 = scalar_lea.vmem %s63_s18, 256  ;;  %p108_p6 = scmp.lt.s32.totalorder %s63_s18, %s63_s18 }
  0x11   :  { %v32_v4 = vsel %vm31_vm0, %v29_v2, 0.0  ;;  %v35_v5 = vsel %vm31_vm0, %v30_v3, 0.0  ;;  %p104_p5 = scmp.ne.s32.totalorder %s63_s18, %s103_s19  ;;  %p109_p7 = scmp.lt.s32.totalorder %s103_s19, %s103_s19 }
  0x12   :  { %33 = vadd.xlane.f32.xlu0 %v32_v4 }
  0x13   :  { %p110_p8 = por %p109_p7, %p108_p6 }
  0x15   :  { %p111_p9 = pnand %p110_p8, %p104_p5 }
  0x16   :  { %36 = vadd.xlane.f32.xlu0 %v35_v5 }
  0x9b   :  { %v34_v6 = vpop.xlane.xlu0 %33 }
  0x9c   :  { %v39_v7 = vmul.f32 0.03125, %v34_v6 }
  0x9e   :  { %v41_v8 = vadd.f32 1e-05, %v39_v7 }
  0x9f   :  { %v37_v9 = vpop.xlane.xlu0 %36 }
  0xa0   :  { %79 = vrsqrt.f32 %v41_v8  ;;  %v40_v10 = vmul.f32 0.03125, %v37_v9 }
  0xa2   :  { %v42_v11 = vadd.f32 1e-05, %v40_v10 }
  0xa4   :  { %81 = vrsqrt.f32 %v42_v11 }
  0xad   :  { %v80_v12 = vpop.eup %79 }
  0xae   :  { %v45_v14 = vmul.f32 %v80_v12, %v26_v0 }
  0xb0   :  { %v53_v15 = vmul.f32 %v74_v13, %v45_v14 }
  0xb1   :  { %v82_v16 = vpop.eup %81 }
  0xb2   :  { %v46_v17 = vmul.f32 %v82_v16, %v27_v1  ;;  %55 = vst.msk [vmem:[#allocation5] sm:$0xff] %vm31_vm0, %v53_v15 }
  0xb4   :  { %v54_v18 = vmul.f32 %v74_v13, %v46_v17 }
  0xb6   :  { %56 = vst.msk [vmem:[#allocation5 + $0x8] sm:$0xff] %vm31_vm0, %v54_v18 }
  0xb7   :  { %114 = shalt.err (!%p111_p9)
}
  0xb8   :  { %68 = dma.vmem_to_hbm [thread:$0]  %s63_s18, 256, %s167_s2, [#allocation4], %s128_s12, %s128_s12, %s129_s13  }
  0xb9   :  { %125 = dma.done.wait [#allocation4], 256  }
  0xba   :  { %126 = vsyncadd [#allocation4], 4294967040 }
  0xbb   :  { %72 = vsyncpa [#allocation3], 1 }
  0xbc   :  { %73 = vsyncpa [#allocation4], 1 }

</bundles_post_ra>
